<compile_context>
chip_gen: v5e
topology: v5e:2x2
jax: 0.10.0
libtpu: 0.0.40
codegen_flags: <defaults>
</compile_context>

<pallas_src>
import functools
import math

import jax
import jax.numpy as jnp
from jax import lax
from jax.experimental import pallas as pl
from jax.experimental.pallas import tpu as pltpu


# ----------------------------- Whittle-index kernel -----------------------------

def whittle_kernel(t_ref, w_ref, *, gamma):
    g = gamma
    T000 = t_ref[0]          # each (TR, 128), dense sublane x lane
    T001 = t_ref[1]
    T010 = t_ref[2]
    T011 = t_ref[3]
    T100 = t_ref[4]
    T101 = t_ref[5]
    T110 = t_ref[6]
    T111 = t_ref[7]

    # Row coefficients (column 0 of each row is exactly 1 or 0):
    #   row1_s0 = (1, p1, q1), row2_s0 = (0, p2, q2)
    #   row3a_s0 = (1, p3, q3), row3b_s0 = (0, p4, q4)
    p1 = g * T000 - 1.0
    q1 = g * T001
    p2 = g * T010 - 1.0
    q2 = g * T011
    p3 = g * T100
    q3 = g * T101 - 1.0
    p4 = g * T110
    q4 = g * T111 - 1.0

    # ---- state 0, candidate 1: rows (1,p1,q1),(0,p2,q2),(1,p3,q3), rhs (0,0,-1)
    det1 = p2 * q3 - q2 * p3 + p1 * q2 - q1 * p2
    inv1 = 1.0 / det1
    num0 = q1 * p2 - p1 * q2           # shared x0 numerator for both s0 candidates
    x0_1 = num0 * inv1
    x1_1 = q2 * inv1
    x2_1 = -p2 * inv1

    # ---- state 0, candidate 2: rows (1,p1,q1),(0,p2,q2),(0,p4,q4), rhs (0,0,-1)
    det2 = p2 * q4 - q2 * p4
    x0_2 = num0 / det2

    lhs0 = x0_1 + 1.0 + g * (T100 * x1_1 + T101 * x2_1)
    rhs0 = 1.0 + g * (T110 * x1_1 + T111 * x2_1)
    w0 = jnp.where(lhs0 >= rhs0, x0_1, x0_2)

    # ---- state 1, candidate 1: rows (1,p3,q3),(0,p4,q4),(1,p1,q1), rhs (-1,-1,0)
    det3 = p4 * q1 - q4 * p1 + p3 * q4 - q3 * p4
    inv3 = 1.0 / det3
    y0_1 = (p3 * q1 - q3 * p1 - p4 * q1 + q4 * p1) * inv3
    y1_1 = (q3 - q4 - q1) * inv3
    y2_1 = (p1 + p4 - p3) * inv3

    # ---- state 1, candidate 2: rows (1,p3,q3),(0,p4,q4),(0,p2,q2), rhs (-1,-1,0)
    det4 = p4 * q2 - q4 * p2
    y0_2 = (p3 * q2 - q3 * p2 - p4 * q2 + q4 * p2) / det4

    lhs1 = y0_1 + g * (T000 * y1_1 + T001 * y2_1)
    rhs1 = g * (T010 * y1_1 + T011 * y2_1)
    w1 = jnp.where(lhs1 >= rhs1, y0_1, y0_2)

    # Two direct sublane-plane stores (no concatenate / shuffle).
    w_ref[0] = w0
    w_ref[1] = w1


def get_whittle_indices_pallas(T, gamma):
    """T: (B, N, 2, 2, 2) float32 -> W: (B, N, 2) float32."""
    B, N = T.shape[0], T.shape[1]
    M = B * N
    LANES, SUB, TR_MAX = 128, 8, 64

    Mr = (M + LANES - 1) // LANES
    Mr = ((Mr + SUB - 1) // SUB) * SUB         # sublane-row count, multiple of 8
    TR = min(Mr, TR_MAX)                       # rows per grid step
    Mr = ((Mr + TR - 1) // TR) * TR            # make Mr a multiple of TR
    Mp = Mr * LANES

    t_flat = T.reshape(M, 8).astype(jnp.float32)
    if Mp != M:
        # pad with a valid dummy transition (0.5 everywhere) -> non-singular systems
        t_flat = jnp.concatenate(
            [t_flat, jnp.full((Mp - M, 8), 0.5, jnp.float32)], axis=0)
    # (Mp, 8) -> (Mr, 128, 8) -> (8, Mr, 128): 8 dense arm planes
    t_planes = jnp.transpose(t_flat.reshape(Mr, LANES, 8), (2, 0, 1))

    kernel = functools.partial(whittle_kernel, gamma=float(gamma))
    w = pl.pallas_call(
        kernel,
        out_shape=jax.ShapeDtypeStruct((2, Mr, LANES), jnp.float32),
        grid=(Mr // TR,),
        in_specs=[pl.BlockSpec((8, TR, LANES), lambda i: (0, i, 0))],
        out_specs=pl.BlockSpec((2, TR, LANES), lambda i: (0, i, 0)),
        compiler_params=pltpu.CompilerParams(dimension_semantics=("parallel",)),
    )(t_planes)

    # (2, Mr, 128) -> (Mr, 128, 2) -> (Mp, 2) -> (M, 2) -> (B, N, 2)
    w = jnp.transpose(w, (1, 2, 0)).reshape(Mp, 2)[:M]
    return w.reshape(B, N, 2)


# ----------------------------- Sinkhorn soft-top-k kernel -----------------------------

def softtopk_kernel(ws_ref, gamma_ref, *, n, k, epsilon, max_iter):
    # ws_ref block: (TB, N) -- batch on sublanes, arms on lanes.
    scores = -ws_ref[...]                         # (TB, N)
    C0 = scores * scores                          # (scores - 0)^2
    sm1 = scores - 1.0
    C1 = sm1 * sm1                                # (scores - 1)^2
    # per-batch-row amax over (anchors, arms)
    cmax = jnp.maximum(jnp.max(C0, axis=1, keepdims=True),
                       jnp.max(C1, axis=1, keepdims=True))     # (TB, 1)

    eps = epsilon
    inv_eps = 1.0 / eps
    eps_log_mu = eps * math.log(1.0 / n)                        # scalar
    eps_log_nu0 = eps * math.log(k / n)                         # scalar
    eps_log_nu1 = eps * math.log((n - k) / n)                   # scalar

    # Loop-invariant: -C_normalized / eps  (cmax normalization folded in)
    scale = inv_eps / cmax                                      # (TB, 1)
    nC0 = -C0 * scale                                           # (TB, N)
    nC1 = -C1 * scale                                           # (TB, N)

    def body(_, carry):
        f, g0, g1 = carry                                       # (TB,N),(TB,1),(TB,1)
        # f-update: 2-element logsumexp over anchors, closed form (no XLU reduce)
        z0 = nC0 + g0 * inv_eps
        z1 = nC1 + g1 * inv_eps
        m = jnp.maximum(z0, z1)
        lse_a = m + jnp.log(1.0 + jnp.exp(-jnp.abs(z0 - z1)))
        f = -eps * lse_a + eps_log_mu                           # (TB, N)
        # g-update: logsumexp over arms (lane reduce), one per anchor
        fe = f * inv_eps
        zf0 = nC0 + fe
        zf1 = nC1 + fe
        m0 = jnp.max(zf0, axis=1, keepdims=True)
        m1 = jnp.max(zf1, axis=1, keepdims=True)
        g0 = -eps * (m0 + jnp.log(jnp.sum(jnp.exp(zf0 - m0), axis=1, keepdims=True))) + eps_log_nu0
        g1 = -eps * (m1 + jnp.log(jnp.sum(jnp.exp(zf1 - m1), axis=1, keepdims=True))) + eps_log_nu1
        return f, g0, g1

    f0 = jnp.zeros_like(scores)
    g0i = jnp.zeros_like(cmax)
    g1i = jnp.zeros_like(cmax)
    f, g0, g1 = lax.fori_loop(0, max_iter, body, (f0, g0i, g1i))

    gamma_ref[0] = jnp.exp(nC0 + (f + g0) * inv_eps)            # anchor-0 plane
    gamma_ref[1] = jnp.exp(nC1 + (f + g1) * inv_eps)            # anchor-1 plane


def soft_topk_pallas(w_state, k, epsilon=0.01, max_iter=200):
    """w_state: (B, N) -> Gamma: (B, N, 2) (transport plan, like TopK_custom)."""
    B, N = w_state.shape
    SUB = 8
    Bp = ((B + SUB - 1) // SUB) * SUB
    TB = Bp if Bp <= 64 else SUB                 # batches per grid step

    ws = w_state.astype(jnp.float32)
    if Bp != B:
        ws = jnp.concatenate([ws, jnp.zeros((Bp - B, N), jnp.float32)], axis=0)

    kernel = functools.partial(
        softtopk_kernel, n=N, k=int(k), epsilon=float(epsilon), max_iter=int(max_iter))
    gamma_planes = pl.pallas_call(
        kernel,
        out_shape=jax.ShapeDtypeStruct((2, Bp, N), jnp.float32),
        grid=(Bp // TB,),
        in_specs=[pl.BlockSpec((TB, N), lambda b: (b, 0))],
        out_specs=pl.BlockSpec((2, TB, N), lambda b: (0, b, 0)),
        compiler_params=pltpu.CompilerParams(dimension_semantics=("parallel",)),
    )(ws)
    # (2, Bp, N) -> (B, N, 2)
    return jnp.transpose(gamma_planes[:, :B, :], (1, 2, 0))


# ----------------------------- RMABSolver wrapper -----------------------------

class RMABSolverPallas:
    def __init__(self, budget, isTrain=True, epsilon=0.01, max_iter=200):
        self.budget = budget
        self.isTrain = isTrain
        self.epsilon = epsilon
        self.max_iter = max_iter

    def forward(self, T, gamma):
        assert T.shape[-3:] == (2, 2, 2)
        if T.ndim == 4:
            T = T[None]
        assert T.ndim == 5
        W = get_whittle_indices_pallas(T, gamma)     # (B, N, 2)

        def pi(state):
            st = jnp.asarray(state).astype(jnp.int32)
            if st.ndim == W.ndim - 2:                 # (N,) -> expand over batch
                st = jnp.broadcast_to(st, W.shape[:-1])
            # gather_incomplete_left: W_state[b, i] = W[b, i, state[b, i]]
            W_state = jnp.take_along_axis(W, st[..., None], axis=-1)[..., 0]
            if self.isTrain:
                Gamma = soft_topk_pallas(W_state, self.budget,
                                         self.epsilon, self.max_iter)
                act = Gamma[..., 0] * W_state.shape[-1]
            else:
                # TODO(synk): eval path (hard torch.topk + one_hot) not implemented;
                # only the isTrain=True differentiable path is exercised here.
                raise NotImplementedError
            return act

        return pi


# ----------------------------- pure-JAX references -----------------------------

def whittle_ref(T, gamma):
    ones = jnp.ones_like(T[..., 0, 0, 0])
    zeros = jnp.zeros_like(ones)
    r1_s0 = jnp.stack([ones, gamma * T[..., 0, 0, 0] - 1, gamma * T[..., 0, 0, 1]], -1)
    r2_s0 = jnp.stack([zeros, gamma * T[..., 0, 1, 0] - 1, gamma * T[..., 0, 1, 1]], -1)
    r3a_s0 = jnp.stack([ones, gamma * T[..., 1, 0, 0], gamma * T[..., 1, 0, 1] - 1], -1)
    r3b_s0 = jnp.stack([zeros, gamma * T[..., 1, 1, 0], gamma * T[..., 1, 1, 1] - 1], -1)
    A1_s0 = jnp.stack([r1_s0, r2_s0, r3a_s0], -2)
    A2_s0 = jnp.stack([r1_s0, r2_s0, r3b_s0], -2)
    b_s0 = jnp.array([0.0, 0.0, -1.0], jnp.float32)
    A1_s1 = jnp.stack([r3a_s0, r3b_s0, r1_s0], -2)
    A2_s1 = jnp.stack([r3a_s0, r3b_s0, r2_s0], -2)
    b_s1 = jnp.array([-1.0, -1.0, 0.0], jnp.float32)

    def solve(A, b):
        bb = jnp.broadcast_to(b, A.shape[:-1])
        return jnp.linalg.solve(A, bb[..., None])[..., 0]

    c1s0, c2s0 = solve(A1_s0, b_s0), solve(A2_s0, b_s0)
    c1s1, c2s1 = solve(A1_s1, b_s1), solve(A2_s1, b_s1)
    m0 = (c1s0[..., 0] + 1.0 + gamma * (T[..., 1, 0, 0] * c1s0[..., 1] + T[..., 1, 0, 1] * c1s0[..., 2])
          >= 1.0 + gamma * (T[..., 1, 1, 0] * c1s0[..., 1] + T[..., 1, 1, 1] * c1s0[..., 2]))
    m1 = (c1s1[..., 0] + gamma * (T[..., 0, 0, 0] * c1s1[..., 1] + T[..., 0, 0, 1] * c1s1[..., 2])
          >= gamma * (T[..., 0, 1, 0] * c1s1[..., 1] + T[..., 0, 1, 1] * c1s1[..., 2]))
    w0 = jnp.where(m0, c1s0[..., 0], c2s0[..., 0])
    w1 = jnp.where(m1, c1s1[..., 0], c2s1[..., 0])
    return jnp.stack([w0, w1], -1)


def soft_topk_ref(scores, k, epsilon, max_iter):
    B, N = scores.shape
    s = scores[..., None]
    anchors = jnp.array([0.0, 1.0], jnp.float32).reshape(1, 1, 2)
    C_raw = (s - anchors) ** 2
    C = C_raw / jnp.max(C_raw, axis=(-2, -1), keepdims=True)
    mu = jnp.full((B, N, 1), 1.0 / N, jnp.float32)
    nu = jnp.array([k / N, (N - k) / N], jnp.float32).reshape(1, 1, 2)
    eps_log_mu = epsilon * jnp.log(mu)
    eps_log_nu = epsilon * jnp.log(nu)

    def body(_, fg):
        f, g = fg
        f = -epsilon * jax.scipy.special.logsumexp(-(C - g) / epsilon, axis=-1, keepdims=True) + eps_log_mu
        g = -epsilon * jax.scipy.special.logsumexp(-(C - f) / epsilon, axis=-2, keepdims=True) + eps_log_nu
        return f, g

    f = jnp.zeros((B, N, 1), jnp.float32)
    g = jnp.zeros((B, 1, 2), jnp.float32)
    f, g = lax.fori_loop(0, max_iter, body, (f, g))
    return jnp.exp((-C + f + g) / epsilon)


# ----------------------------- main -----------------------------

if __name__ == "__main__":
    key = jax.random.PRNGKey(0)
    B, N, budget = 2, 8, 2
    gamma = 0.95

    k1, k2 = jax.random.split(key)
    T_raw = jax.random.uniform(k1, (B, N, 2, 2, 2), jnp.float32, 0.1, 1.0)
    T = T_raw / jnp.sum(T_raw, axis=-1, keepdims=True)     # valid transition probs
    state = jax.random.randint(k2, (N,), 0, 2)              # current state per arm

    solver = RMABSolverPallas(budget=budget, isTrain=True)
    pi = solver.forward(T, gamma)
    act = jax.block_until_ready(pi(state))
    assert act.shape == (B, N)

    # reference check (plain JAX)
    W_ref = whittle_ref(T, gamma)
    st_b = jnp.broadcast_to(state, (B, N))
    W_state_ref = jnp.take_along_axis(W_ref, st_b[..., None], axis=-1)[..., 0]
    Gamma_ref = soft_topk_ref(-W_state_ref, budget, 0.01, 200)
    act_ref = Gamma_ref[..., 0] * N

    assert jnp.allclose(act, act_ref, rtol=1e-3, atol=1e-3), (act, act_ref)
    print("KERNEL_OK")
</pallas_src>

<mosaic_0001>
module attributes {stable_mosaic.version = 11 : i64} {
  func.func @whittle_kernel(%arg0: i32, %arg1: memref<8x8x128xf32, #tpu.memory_space<vmem>>, %arg2: memref<2x8x128xf32, #tpu.memory_space<vmem>>) attributes {dimension_semantics = [#tpu.dimension_semantics<parallel>], iteration_bounds = array<i64: 1>, scalar_prefetch = 0 : i64, scratch_operands = 0 : i64, tpu.core_type = #tpu.core_type<tc>, window_params = [{transform_indices = @transform_0, window_bounds = array<i64: 8, 8, 128>}, {transform_indices = @transform_1, window_bounds = array<i64: 2, 8, 128>}]} {
    %c0 = arith.constant 0 : index
    %c0_0 = arith.constant 0 : index
    %c0_1 = arith.constant 0 : index
    %0 = vector.load %arg1[%c0, %c0_0, %c0_1] : memref<8x8x128xf32, #tpu.memory_space<vmem>>, vector<1x8x128xf32>
    %1 = vector.shape_cast %0 : vector<1x8x128xf32> to vector<8x128xf32>
    %c1 = arith.constant 1 : index
    %c0_2 = arith.constant 0 : index
    %c0_3 = arith.constant 0 : index
    %2 = vector.load %arg1[%c1, %c0_2, %c0_3] : memref<8x8x128xf32, #tpu.memory_space<vmem>>, vector<1x8x128xf32>
    %3 = vector.shape_cast %2 : vector<1x8x128xf32> to vector<8x128xf32>
    %c2 = arith.constant 2 : index
    %c0_4 = arith.constant 0 : index
    %c0_5 = arith.constant 0 : index
    %4 = vector.load %arg1[%c2, %c0_4, %c0_5] : memref<8x8x128xf32, #tpu.memory_space<vmem>>, vector<1x8x128xf32>
    %5 = vector.shape_cast %4 : vector<1x8x128xf32> to vector<8x128xf32>
    %c3 = arith.constant 3 : index
    %c0_6 = arith.constant 0 : index
    %c0_7 = arith.constant 0 : index
    %6 = vector.load %arg1[%c3, %c0_6, %c0_7] : memref<8x8x128xf32, #tpu.memory_space<vmem>>, vector<1x8x128xf32>
    %7 = vector.shape_cast %6 : vector<1x8x128xf32> to vector<8x128xf32>
    %c4 = arith.constant 4 : index
    %c0_8 = arith.constant 0 : index
    %c0_9 = arith.constant 0 : index
    %8 = vector.load %arg1[%c4, %c0_8, %c0_9] : memref<8x8x128xf32, #tpu.memory_space<vmem>>, vector<1x8x128xf32>
    %9 = vector.shape_cast %8 : vector<1x8x128xf32> to vector<8x128xf32>
    %c5 = arith.constant 5 : index
    %c0_10 = arith.constant 0 : index
    %c0_11 = arith.constant 0 : index
    %10 = vector.load %arg1[%c5, %c0_10, %c0_11] : memref<8x8x128xf32, #tpu.memory_space<vmem>>, vector<1x8x128xf32>
    %11 = vector.shape_cast %10 : vector<1x8x128xf32> to vector<8x128xf32>
    %c6 = arith.constant 6 : index
    %c0_12 = arith.constant 0 : index
    %c0_13 = arith.constant 0 : index
    %12 = vector.load %arg1[%c6, %c0_12, %c0_13] : memref<8x8x128xf32, #tpu.memory_space<vmem>>, vector<1x8x128xf32>
    %13 = vector.shape_cast %12 : vector<1x8x128xf32> to vector<8x128xf32>
    %c7 = arith.constant 7 : index
    %c0_14 = arith.constant 0 : index
    %c0_15 = arith.constant 0 : index
    %14 = vector.load %arg1[%c7, %c0_14, %c0_15] : memref<8x8x128xf32, #tpu.memory_space<vmem>>, vector<1x8x128xf32>
    %15 = vector.shape_cast %14 : vector<1x8x128xf32> to vector<8x128xf32>
    %cst = arith.constant 0.949999988 : f32
    %16 = vector.broadcast %cst : f32 to vector<8x128xf32>
    %17 = arith.mulf %16, %1 : vector<8x128xf32>
    %cst_16 = arith.constant 1.000000e+00 : f32
    %18 = vector.broadcast %cst_16 : f32 to vector<8x128xf32>
    %19 = arith.subf %17, %18 : vector<8x128xf32>
    %cst_17 = arith.constant 0.949999988 : f32
    %20 = vector.broadcast %cst_17 : f32 to vector<8x128xf32>
    %21 = arith.mulf %20, %3 : vector<8x128xf32>
    %cst_18 = arith.constant 0.949999988 : f32
    %22 = vector.broadcast %cst_18 : f32 to vector<8x128xf32>
    %23 = arith.mulf %22, %5 : vector<8x128xf32>
    %cst_19 = arith.constant 1.000000e+00 : f32
    %24 = vector.broadcast %cst_19 : f32 to vector<8x128xf32>
    %25 = arith.subf %23, %24 : vector<8x128xf32>
    %cst_20 = arith.constant 0.949999988 : f32
    %26 = vector.broadcast %cst_20 : f32 to vector<8x128xf32>
    %27 = arith.mulf %26, %7 : vector<8x128xf32>
    %cst_21 = arith.constant 0.949999988 : f32
    %28 = vector.broadcast %cst_21 : f32 to vector<8x128xf32>
    %29 = arith.mulf %28, %9 : vector<8x128xf32>
    %cst_22 = arith.constant 0.949999988 : f32
    %30 = vector.broadcast %cst_22 : f32 to vector<8x128xf32>
    %31 = arith.mulf %30, %11 : vector<8x128xf32>
    %cst_23 = arith.constant 1.000000e+00 : f32
    %32 = vector.broadcast %cst_23 : f32 to vector<8x128xf32>
    %33 = arith.subf %31, %32 : vector<8x128xf32>
    %cst_24 = arith.constant 0.949999988 : f32
    %34 = vector.broadcast %cst_24 : f32 to vector<8x128xf32>
    %35 = arith.mulf %34, %13 : vector<8x128xf32>
    %cst_25 = arith.constant 0.949999988 : f32
    %36 = vector.broadcast %cst_25 : f32 to vector<8x128xf32>
    %37 = arith.mulf %36, %15 : vector<8x128xf32>
    %cst_26 = arith.constant 1.000000e+00 : f32
    %38 = vector.broadcast %cst_26 : f32 to vector<8x128xf32>
    %39 = arith.subf %37, %38 : vector<8x128xf32>
    %40 = arith.mulf %25, %33 : vector<8x128xf32>
    %41 = arith.mulf %27, %29 : vector<8x128xf32>
    %42 = arith.subf %40, %41 : vector<8x128xf32>
    %43 = arith.mulf %19, %27 : vector<8x128xf32>
    %44 = arith.addf %42, %43 : vector<8x128xf32>
    %45 = arith.mulf %21, %25 : vector<8x128xf32>
    %46 = arith.subf %44, %45 : vector<8x128xf32>
    %cst_27 = arith.constant 1.000000e+00 : f32
    %47 = vector.broadcast %cst_27 : f32 to vector<8x128xf32>
    %48 = arith.divf %47, %46 : vector<8x128xf32>
    %49 = arith.mulf %21, %25 : vector<8x128xf32>
    %50 = arith.mulf %19, %27 : vector<8x128xf32>
    %51 = arith.subf %49, %50 : vector<8x128xf32>
    %52 = arith.mulf %51, %48 : vector<8x128xf32>
    %53 = arith.mulf %27, %48 : vector<8x128xf32>
    %cst_28 = arith.constant 0.000000e+00 : f32
    %54 = vector.broadcast %cst_28 : f32 to vector<8x128xf32>
    %55 = arith.subf %54, %25 : vector<8x128xf32>
    %56 = arith.mulf %55, %48 : vector<8x128xf32>
    %57 = arith.mulf %25, %39 : vector<8x128xf32>
    %58 = arith.mulf %27, %35 : vector<8x128xf32>
    %59 = arith.subf %57, %58 : vector<8x128xf32>
    %60 = arith.divf %51, %59 : vector<8x128xf32>
    %cst_29 = arith.constant 1.000000e+00 : f32
    %61 = vector.broadcast %cst_29 : f32 to vector<8x128xf32>
    %62 = arith.addf %52, %61 : vector<8x128xf32>
    %63 = arith.mulf %9, %53 : vector<8x128xf32>
    %64 = arith.mulf %11, %56 : vector<8x128xf32>
    %65 = arith.addf %63, %64 : vector<8x128xf32>
    %cst_30 = arith.constant 0.949999988 : f32
    %66 = vector.broadcast %cst_30 : f32 to vector<8x128xf32>
    %67 = arith.mulf %66, %65 : vector<8x128xf32>
    %68 = arith.addf %62, %67 : vector<8x128xf32>
    %69 = arith.mulf %13, %53 : vector<8x128xf32>
    %70 = arith.mulf %15, %56 : vector<8x128xf32>
    %71 = arith.addf %69, %70 : vector<8x128xf32>
    %cst_31 = arith.constant 0.949999988 : f32
    %72 = vector.broadcast %cst_31 : f32 to vector<8x128xf32>
    %73 = arith.mulf %72, %71 : vector<8x128xf32>
    %cst_32 = arith.constant 1.000000e+00 : f32
    %74 = vector.broadcast %cst_32 : f32 to vector<8x128xf32>
    %75 = arith.addf %74, %73 : vector<8x128xf32>
    %76 = arith.cmpf oge, %68, %75 : vector<8x128xf32>
    %77 = arith.select %76, %52, %60 : vector<8x128xi1>, vector<8x128xf32>
    %78 = arith.mulf %35, %21 : vector<8x128xf32>
    %79 = arith.mulf %39, %19 : vector<8x128xf32>
    %80 = arith.subf %78, %79 : vector<8x128xf32>
    %81 = arith.mulf %29, %39 : vector<8x128xf32>
    %82 = arith.addf %80, %81 : vector<8x128xf32>
    %83 = arith.mulf %33, %35 : vector<8x128xf32>
    %84 = arith.subf %82, %83 : vector<8x128xf32>
    %cst_33 = arith.constant 1.000000e+00 : f32
    %85 = vector.broadcast %cst_33 : f32 to vector<8x128xf32>
    %86 = arith.divf %85, %84 : vector<8x128xf32>
    %87 = arith.mulf %29, %21 : vector<8x128xf32>
    %88 = arith.mulf %33, %19 : vector<8x128xf32>
    %89 = arith.subf %87, %88 : vector<8x128xf32>
    %90 = arith.mulf %35, %21 : vector<8x128xf32>
    %91 = arith.subf %89, %90 : vector<8x128xf32>
    %92 = arith.mulf %39, %19 : vector<8x128xf32>
    %93 = arith.addf %91, %92 : vector<8x128xf32>
    %94 = arith.mulf %93, %86 : vector<8x128xf32>
    %95 = arith.subf %33, %39 : vector<8x128xf32>
    %96 = arith.subf %95, %21 : vector<8x128xf32>
    %97 = arith.mulf %96, %86 : vector<8x128xf32>
    %98 = arith.addf %19, %35 : vector<8x128xf32>
    %99 = arith.subf %98, %29 : vector<8x128xf32>
    %100 = arith.mulf %99, %86 : vector<8x128xf32>
    %101 = arith.mulf %35, %27 : vector<8x128xf32>
    %102 = arith.mulf %39, %25 : vector<8x128xf32>
    %103 = arith.subf %101, %102 : vector<8x128xf32>
    %104 = arith.mulf %29, %27 : vector<8x128xf32>
    %105 = arith.mulf %33, %25 : vector<8x128xf32>
    %106 = arith.subf %104, %105 : vector<8x128xf32>
    %107 = arith.mulf %35, %27 : vector<8x128xf32>
    %108 = arith.subf %106, %107 : vector<8x128xf32>
    %109 = arith.mulf %39, %25 : vector<8x128xf32>
    %110 = arith.addf %108, %109 : vector<8x128xf32>
    %111 = arith.divf %110, %103 : vector<8x128xf32>
    %112 = arith.mulf %1, %97 : vector<8x128xf32>
    %113 = arith.mulf %3, %100 : vector<8x128xf32>
    %114 = arith.addf %112, %113 : vector<8x128xf32>
    %cst_34 = arith.constant 0.949999988 : f32
    %115 = vector.broadcast %cst_34 : f32 to vector<8x128xf32>
    %116 = arith.mulf %115, %114 : vector<8x128xf32>
    %117 = arith.addf %94, %116 : vector<8x128xf32>
    %118 = arith.mulf %5, %97 : vector<8x128xf32>
    %119 = arith.mulf %7, %100 : vector<8x128xf32>
    %120 = arith.addf %118, %119 : vector<8x128xf32>
    %cst_35 = arith.constant 0.949999988 : f32
    %121 = vector.broadcast %cst_35 : f32 to vector<8x128xf32>
    %122 = arith.mulf %121, %120 : vector<8x128xf32>
    %123 = arith.cmpf oge, %117, %122 : vector<8x128xf32>
    %124 = arith.select %123, %94, %111 : vector<8x128xi1>, vector<8x128xf32>
    %c0_36 = arith.constant 0 : index
    %c0_37 = arith.constant 0 : index
    %c0_38 = arith.constant 0 : index
    %125 = vector.load %arg2[%c0_36, %c0_37, %c0_38] : memref<2x8x128xf32, #tpu.memory_space<vmem>>, vector<1x8x128xf32>
    %126 = vector.shape_cast %125 : vector<1x8x128xf32> to vector<8x128xf32>
    %127 = vector.shape_cast %77 : vector<8x128xf32> to vector<1x8x128xf32>
    tpu.vector_store %arg2[%c0_36, %c0_37, %c0_38], %127 {strides = array<i32>} : memref<2x8x128xf32, #tpu.memory_space<vmem>>, vector<1x8x128xf32>,
    %c1_39 = arith.constant 1 : index
    %c0_40 = arith.constant 0 : index
    %c0_41 = arith.constant 0 : index
    %128 = vector.load %arg2[%c1_39, %c0_40, %c0_41] : memref<2x8x128xf32, #tpu.memory_space<vmem>>, vector<1x8x128xf32>
    %129 = vector.shape_cast %128 : vector<1x8x128xf32> to vector<8x128xf32>
    %130 = vector.shape_cast %124 : vector<8x128xf32> to vector<1x8x128xf32>
    tpu.vector_store %arg2[%c1_39, %c0_40, %c0_41], %130 {strides = array<i32>} : memref<2x8x128xf32, #tpu.memory_space<vmem>>, vector<1x8x128xf32>,
    return
  }
  func.func @transform_0(%arg0: i32) -> (i32, i32, i32) {
    %c0_i32 = arith.constant 0 : i32
    %c0_i32_0 = arith.constant 0 : i32
    %c0_i32_1 = arith.constant 0 : i32
    return %c0_i32, %arg0, %c0_i32_0 : i32, i32, i32
  }
  func.func @transform_1(%arg0: i32) -> (i32, i32, i32) {
    %c0_i32 = arith.constant 0 : i32
    %c0_i32_0 = arith.constant 0 : i32
    %c0_i32_1 = arith.constant 0 : i32
    return %c0_i32, %arg0, %c0_i32_0 : i32, i32, i32
  }
}

</mosaic_0001>

<bundles_post_ra>
// kernel: tpu_custom_call.1
= control target key start
LH: loop header
LB: loop body
LE: loop exit
PB: predicated region body
PF: predicated region fallthrough
CT: control target
= control target key end

     0   :  { %6 = vsyncpa [#allocation3], 0  ;;  %s430_s0 = inlined_call_operand.hbm [shape: f32[8,8,128], index: 0, kind: input, shape index: {}]   ;;  %s431_s1 = inlined_call_operand.hbm [shape: f32[2,8,128], index: 1, kind: output, shape index: {}]  }
   0x1   :  { %7 = vsyncpa [#allocation4], 0  ;;  %s12_s8 = sshll.u32 %s430_s0, 4  ;;  %s264_s9 = smov [#allocation2]   ;;  %s13_s8 = int_to_ptr.hbm [resolvable:$true] %s12_s8 }
   0x2   :  { %s14_s10 = sshll.u32 %s264_s9, 4  ;;  %s265_s11 = smov 128   ;;  %s15_s10 = int_to_ptr.vmem [resolvable:$true] %s14_s10 }
   0x3   :  { %s266_s12 = smov 8  }
   0x4   :  { %20 = dma.hbm_to_vmem [thread:$0]  %s13_s8, 1024, %s15_s10, [#allocation3], %s265_s11, %s265_s11, %s266_s12  }
   0x5   :  { %260 = dma.done.wait [#allocation3], 1024  }
   0x6   :  { %261 = vsyncadd [#allocation3], 4294966272  ;;  %v284_v0 = vld [vmem:[#allocation2] sm:$0xff]  ;;  %v286_v1 = vld [vmem:[#allocation2 + $0x8] sm:$0xff]  ;;  %s267_s0 = smov [#allocation5]   ;;  %s183_s16 = sshll.u32 %s431_s1, 4  ;;  %s184_s16 = int_to_ptr.hbm [resolvable:$true] %s183_s16 }
   0x7   :  { %v288_v2 = vld [vmem:[#allocation2 + $0x10] sm:$0xff]  ;;  %v290_v3 = vld [vmem:[#allocation2 + $0x18] sm:$0xff]  ;;  %v292_v4 = vld [vmem:[#allocation2 + $0x20] sm:$0xff]  ;;  %v40_v6 = vmul.f32 0.95, %v284_v0  ;;  %s181_s13 = sshll.u32 %s267_s0, 4  ;;  %s182_s13 = int_to_ptr.vmem [resolvable:$true] %s181_s13 }
   0x8   :  { %v294_v5 = vld [vmem:[#allocation2 + $0x28] sm:$0xff]  ;;  %v297_v7 = vld [vmem:[#allocation2 + $0x30] sm:$0xff]  ;;  %v299_v8 = vld [vmem:[#allocation2 + $0x38] sm:$0xff]  ;;  %v43_v9 = vmul.f32 0.95, %v288_v2 }
   0x9   :  { %v42_v10 = vmul.f32 0.95, %v286_v1  ;;  %v304_v11 = vmul.f32 0.95, %v290_v3  ;;  %v307_v12 = vmul.f32 0.95, %v292_v4 }
   0xa   :  { %v309_v13 = vadd.f32 -1.0, %v43_v9  ;;  %v47_v14 = vmul.f32 0.95, %v294_v5  ;;  %v49_v15 = vmul.f32 0.95, %v297_v7  ;;  %v196_v16 = vadd.f32 -1.0, %v40_v6 }
   0xb   :  { %v50_v17 = vmul.f32 0.95, %v299_v8  ;;  %v316_v19 = vmul.f32 %v307_v12, %v304_v11  ;;  %v132_v39 = vmul.f32 %v307_v12, %v42_v10 }
   0xc   :  { %v198_v18 = vadd.f32 -1.0, %v47_v14  ;;  %v319_v21 = vmul.f32 %v49_v15, %v304_v11  ;;  %v110_v22 = vmul.f32 %v49_v15, %v42_v10  ;;  %v55_v24 = vmul.f32 %v196_v16, %v304_v11 }
   0xd   :  { %v199_v20 = vadd.f32 -1.0, %v50_v17  ;;  %v57_v28 = vmul.f32 %v309_v13, %v42_v10  ;;  %v345_v41 = vadd.f32 %v196_v16, %v49_v15  ;;  %v77_v47 = vsub.f32 0.0, %v309_v13 }
   0xe   :  { %v322_v23 = vmul.f32 %v198_v18, %v309_v13  ;;  %v115_v34 = vmul.f32 %v198_v18, %v49_v15  ;;  %v133_v40 = vmul.f32 %v198_v18, %v196_v16 }
   0xf   :  { %v326_v25 = vmul.f32 %v199_v20, %v309_v13  ;;  %v328_v26 = vmul.f32 %v199_v20, %v196_v16  ;;  %v113_v29 = vmul.f32 %v199_v20, %v307_v12  ;;  %v138_v43 = vsub.f32 %v198_v18, %v199_v20 }
  0x10   :  { %v54_v27 = vsub.f32 %v322_v23, %v316_v19  ;;  %v350_v46 = vsub.f32 %v57_v28, %v55_v24  ;;  %v134_v52 = vsub.f32 %v132_v39, %v133_v40  ;;  %v142_v53 = vsub.f32 %v345_v41, %v307_v12 }
  0x11   :  { %v81_v30 = vsub.f32 %v326_v25, %v319_v21  ;;  %v112_v31 = vsub.f32 %v110_v22, %v328_v26  ;;  %v339_v32 = vsub.f32 %v319_v21, %v326_v25  ;;  %v139_v54 = vsub.f32 %v138_v43, %v42_v10 }
  0x12   :  { %v56_v33 = vadd.f32 %v55_v24, %v54_v27  ;;  %v145_v55 = vsub.f32 %v316_v19, %v322_v23  ;;  %v135_v17 = vsub.f32 %v134_v52, %v110_v22 }
  0x13   :  { %204 = vrcp.f32 %v81_v30  ;;  %v114_v36 = vadd.f32 %v113_v29, %v112_v31  ;;  %vm87_vm1 = vweird.f32 %v81_v30  ;;  %v91_v60 = vand.u32 2147483647, %v81_v30 }
  0x14   :  { %v58_v35 = vsub.f32 %v56_v33, %v57_v28  ;;  %206 = vrcp.f32 %v339_v32  ;;  %v93_v61 = vand.u32 2147483648, %v81_v30  ;;  %vm153_vm12 = vweird.f32 %v339_v32 }
  0x15   :  { %v116_v37 = vsub.f32 %v114_v36, %v115_v34  ;;  %vm372_vm9 = vcmp.eq.f32.partialorder %v91_v60, 8.507059e+37  ;;  %v159_v29 = vand.u32 2147483648, %v339_v32  ;;  %v146_v40 = vsub.f32 %v145_v55, %v319_v21 }
  0x16   :  { %208 = vrcp.f32 %v58_v35  ;;  %v70_v51 = vand.u32 2147483648, %v58_v35  ;;  %vm64_vm0 = vweird.f32 %v58_v35  ;;  %v68_v58 = vand.u32 2147483647, %v58_v35 }
  0x17   :  { %210 = vrcp.f32 %v116_v37  ;;  %v126_v12 = vand.u32 2147483647, %v116_v37  ;;  %vm122_vm5 = vweird.f32 %v116_v37  ;;  %v128_v14 = vand.u32 2147483648, %v116_v37 }
  0x18   :  { %v71_v9 = vor.u32 1.1754944e-38, %v70_v51  ;;  %vm69_vm7 = vcmp.eq.f32.partialorder %v68_v58, 8.507059e+37  ;;  %v94_v20 = vor.u32 1.1754944e-38, %v93_v61 }
  0x19   :  { %v342_v38 = vpop.eup %204  ;;  %vm383_vm11 = vcmp.eq.f32.partialorder %v126_v12, 8.507059e+37  ;;  %v129_v33 = vor.u32 1.1754944e-38, %v128_v14 }
  0x1a   :  { %v83_v42 = vmul.f32 %v342_v38, %v81_v30  ;;  %v348_v44 = vpop.eup %206  ;;  %vm88_vm3 = vweird.f32 %v342_v38 }
  0x1b   :  { %v149_v49 = vmul.f32 %v348_v44, %v339_v32  ;;  %vm368_vm8 = vmor %vm87_vm1, %vm88_vm3  ;;  %vm154_vm13 = vweird.f32 %v348_v44 }
  0x1c   :  { %v209_v45 = vpop.eup %208  ;;  %v84_v48 = vsub.f32 1.0, %v83_v42  ;;  %v157_v42 = vand.u32 2147483647, %v339_v32  ;;  %vm406_vm14 = vmor %vm153_vm12, %vm154_vm13 }
  0x1d   :  { %v60_v50 = vmul.f32 %v209_v45, %v58_v35  ;;  %v211_v56 = vpop.eup %210  ;;  %vm65_vm2 = vweird.f32 %v209_v45  ;;  %v150_v63 = vsub.f32 1.0, %v149_v49  ;;  %v160_v49 = vor.u32 1.1754944e-38, %v159_v29 }
  0x1e   :  { %v85_v59 = vmul.f32 %v342_v38, %v84_v48  ;;  %v118_v62 = vmul.f32 %v211_v56, %v116_v37  ;;  %vm362_vm4 = vmor %vm64_vm0, %vm65_vm2  ;;  %vm123_vm6 = vweird.f32 %v211_v56  ;;  %vm158_vm15 = vcmp.eq.f32.partialorder %v157_v42, 8.507059e+37 }
  0x1f   :  { %v61_v57 = vsub.f32 1.0, %v60_v50  ;;  %v151_v24 = vmul.f32 %v348_v44, %v150_v63  ;;  %vm379_vm10 = vmor %vm122_vm5, %vm123_vm6 }
  0x20   :  { %v119_v13 = vsub.f32 1.0, %v118_v62  ;;  %v86_v16 = vadd.f32 %v342_v38, %v85_v59  ;;  %v147_v59 = vadd.f32 %v146_v40, %v326_v25 }
  0x21   :  { %v62_v6 = vmul.f32 %v209_v45, %v61_v57  ;;  %v152_v41 = vadd.f32 %v348_v44, %v151_v24 }
  0x22   :  { %v120_v23 = vmul.f32 %v211_v56, %v119_v13  ;;  %v90_v37 = vsel %vm368_vm8, %v342_v38, %v86_v16 }
  0x23   :  { %v63_v15 = vadd.f32 %v209_v45, %v62_v6  ;;  %v95_v21 = vsel %vm372_vm9, %v94_v20, %v90_v37  ;;  %v156_v32 = vsel %vm406_vm14, %v348_v44, %v152_v41 }
  0x24   :  { %v121_v31 = vadd.f32 %v211_v56, %v120_v23  ;;  %v96_v57 = vmul.f32 %v95_v21, %v350_v46  ;;  %v161_v61 = vsel %vm158_vm15, %v160_v49, %v156_v32 }
  0x25   :  { %v67_v27 = vsel %vm362_vm4, %v209_v45, %v63_v15 }
  0x26   :  { %v72_v30 = vsel %vm69_vm7, %v71_v9, %v67_v27  ;;  %v125_v39 = vsel %vm379_vm10, %v211_v56, %v121_v31 }
  0x27   :  { %v75_v34 = vmul.f32 %v350_v46, %v72_v30  ;;  %v76_v35 = vmul.f32 %v72_v30, %v304_v11  ;;  %v78_v36 = vmul.f32 %v77_v47, %v72_v30  ;;  %v136_v47 = vadd.f32 %v135_v17, %v328_v26 }
  0x29   :  { %v98_v43 = vmul.f32 %v76_v35, %v292_v4  ;;  %v99_v45 = vmul.f32 %v78_v36, %v294_v5  ;;  %v103_v11 = vmul.f32 %v76_v35, %v297_v7  ;;  %v104_v48 = vmul.f32 %v78_v36, %v299_v8 }
  0x2a   :  { %v130_v4 = vsel %vm383_vm11, %v129_v33, %v125_v39  ;;  %v97_v5 = vadd.f32 1.0, %v75_v34 }
  0x2b   :  { %v100_v50 = vadd.f32 %v99_v45, %v98_v43  ;;  %v140_v7 = vmul.f32 %v139_v54, %v130_v4  ;;  %v143_v51 = vmul.f32 %v142_v53, %v130_v4  ;;  %v105_v26 = vadd.f32 %v104_v48, %v103_v11 }
  0x2c   :  { %v137_v60 = vmul.f32 %v136_v47, %v130_v4 }
  0x2d   :  { %v101_v52 = vmul.f32 0.95, %v100_v50  ;;  %v163_v55 = vmul.f32 %v140_v7, %v284_v0  ;;  %v164_v56 = vmul.f32 %v143_v51, %v286_v1  ;;  %v168_v8 = vmul.f32 %v140_v7, %v288_v2 }
  0x2e   :  { %v106_v58 = vmul.f32 0.95, %v105_v26  ;;  %v169_v53 = vmul.f32 %v143_v51, %v290_v3  ;;  %v162_v0 = vmul.f32 %v161_v61, %v147_v59 }
  0x2f   :  { %v102_v54 = vadd.f32 %v101_v52, %v97_v5  ;;  %v165_v62 = vadd.f32 %v164_v56, %v163_v55 }
  0x30   :  { %v107_v44 = vadd.f32 1.0, %v106_v58  ;;  %v170_v63 = vadd.f32 %v169_v53, %v168_v8 }
  0x31   :  { %v166_v6 = vmul.f32 0.95, %v165_v62 }
  0x32   :  { %vm108_vm0 = vcmp.ge.f32.partialorder %v102_v54, %v107_v44  ;;  %v171_v9 = vmul.f32 0.95, %v170_v63 }
  0x33   :  { %v109_v1 = vsel %vm108_vm0, %v75_v34, %v96_v57  ;;  %v167_v2 = vadd.f32 %v166_v6, %v137_v60 }
  0x34   :  { %174 = vst [vmem:[#allocation5] sm:$0xff] %v109_v1 }
  0x35   :  { %vm172_vm1 = vcmp.ge.f32.partialorder %v167_v2, %v171_v9 }
  0x36   :  { %v173_v3 = vsel %vm172_vm1, %v137_v60, %v162_v0 }
  0x37   :  { %176 = vst [vmem:[#allocation5 + $0x8] sm:$0xff] %v173_v3 }
  0x38   :  { %189 = dma.vmem_to_hbm [thread:$0]  %s182_s13, 256, %s184_s16, [#allocation4], %s265_s11, %s265_s11, %s266_s12  }
  0x39   :  { %262 = dma.done.wait [#allocation4], 256  }
  0x3a   :  { %263 = vsyncadd [#allocation4], 4294967040 }
  0x3b   :  { %194 = vsyncpa [#allocation3], 1 }
  0x3c   :  { %195 = vsyncpa [#allocation4], 1 }

</bundles_post_ra>
